<compile_context>
chip_gen: v5e
topology: v5e:2x2
jax: 0.10.0
libtpu: 0.0.40
codegen_flags: <defaults>
</compile_context>

<pallas_src>
import jax
import jax.numpy as jnp
from jax.experimental import pallas as pl
from jax.experimental.pallas import tpu as pltpu


def _round_up(x, m):
    return ((x + m - 1) // m) * m


def _mlp_kernel(x_ref, w1_ref, b1_ref, w2_ref, b2_ref, out_ref):
    # x_ref:  (bb, S)   w1_ref: (S, H)  b1_ref: (1, H)
    # w2_ref: (H, A)    b2_ref: (1, A)  out_ref: (bb, A)
    h = jnp.dot(x_ref[...], w1_ref[...], preferred_element_type=jnp.float32)
    h = jnp.maximum(h + b1_ref[...], 0.0)        # triple ReLU == one ReLU
    out = jnp.dot(h.astype(w2_ref.dtype), w2_ref[...],
                  preferred_element_type=jnp.float32) + b2_ref[...]
    out_ref[...] = out.astype(out_ref.dtype)


def prepare_params(w1, b1, w2, b2):
    """One-time parameter prep (call OUTSIDE the per-step jit):
    biases reshaped to (1, n) rows, everything f32. No padding needed."""
    return (jnp.asarray(w1, jnp.float32),
            jnp.asarray(b1, jnp.float32).reshape(1, -1),
            jnp.asarray(w2, jnp.float32),
            jnp.asarray(b2, jnp.float32).reshape(1, -1))


def updated_model_forward(state, w1, b1, w2, b2, *,
                          block_b=4096, gridless_max=256):
    """Fused UpdatedModel forward: ReLU(state @ w1 + b1) @ w2 + b2.

    state: (B, S) f32, w1: (S, H), b1: (1, H), w2: (H, A), b2: (1, A)
    (use prepare_params once to get the (1, n) bias rows) -> (B, A) f32.
    """
    B, S = state.shape
    H = w1.shape[1]
    A = w2.shape[1]
    sub = 8  # f32 sublane packing

    cost = pl.CostEstimate(
        flops=2 * B * (S * H + H * A),
        transcendentals=0,
        bytes_accessed=4 * (B * S + S * H + H + H * A + A + B * A),
    )
    out_shape = jax.ShapeDtypeStruct((B, A), jnp.float32)

    if B <= gridless_max:
        # Small batch (typical RL step): single VMEM block, gridless call —
        # no per-step pipeline overhead; latency-bound anyway, so one TC is fine.
        return pl.pallas_call(
            _mlp_kernel, out_shape=out_shape, cost_estimate=cost,
        )(state, w1, b1, w2, b2)

    # Medium/large batch: tile rows so the grid has >= 2 steps (v7x: the
    # "parallel" axis then shards rows across both TensorCores), capped at
    # block_b rows per step for HBM-pipeline efficiency.
    bb = min(block_b, _round_up((B + 1) // 2, sub))
    grid = (pl.cdiv(B, bb),)

    return pl.pallas_call(
        _mlp_kernel,
        out_shape=out_shape,
        grid_spec=pl.GridSpec(
            grid=grid,
            in_specs=[
                pl.BlockSpec((bb, S), lambda i: (i, 0)),   # activations: batch-tiled
                # Weights/biases: constant index_map -> VMEM-resident across
                # all grid steps (no per-step re-DMA). ~10 KB total, so
                # single-buffering them (pl.Buffered(1)) buys nothing here.
                pl.BlockSpec((S, H), lambda i: (0, 0)),
                pl.BlockSpec((1, H), lambda i: (0, 0)),
                pl.BlockSpec((H, A), lambda i: (0, 0)),
                pl.BlockSpec((1, A), lambda i: (0, 0)),
            ],
            out_specs=pl.BlockSpec((bb, A), lambda i: (i, 0)),
        ),
        compiler_params=pltpu.CompilerParams(
            dimension_semantics=("parallel",),   # v7x: split rows across both TCs
        ),
        cost_estimate=cost,
    )(state, w1, b1, w2, b2)


def _ref_forward(state, w1, b1, w2, b2):
    """Plain-JAX reference (original f32 semantics)."""
    h = jnp.maximum(jnp.dot(state, w1) + b1, 0.0)
    return jnp.dot(h, w2) + b2


def init_params(key, state_size, hidden, action_size):
    """Mimics torch.nn.Linear default init: U(-1/sqrt(fan_in), +1/sqrt(fan_in))."""
    k1, k2, k3, k4 = jax.random.split(key, 4)
    bound1 = 1.0 / jnp.sqrt(state_size)
    bound2 = 1.0 / jnp.sqrt(hidden)
    w1 = jax.random.uniform(k1, (state_size, hidden), jnp.float32, -bound1, bound1)
    b1 = jax.random.uniform(k2, (hidden,), jnp.float32, -bound1, bound1)
    w2 = jax.random.uniform(k3, (hidden, action_size), jnp.float32, -bound2, bound2)
    b2 = jax.random.uniform(k4, (action_size,), jnp.float32, -bound2, bound2)
    return w1, b1, w2, b2


if __name__ == "__main__":
    key = jax.random.PRNGKey(0)
    k_x, k_xb, k_p = jax.random.split(key, 3)

    state_size, hidden, action_size = 32, 64, 8
    w1, b1, w2, b2 = init_params(k_p, state_size, hidden, action_size)
    params = prepare_params(w1, b1, w2, b2)   # once, outside the step loop

    fwd = jax.jit(updated_model_forward,
                  static_argnames=("block_b", "gridless_max"))

    # 1) Small f32 case (typical RL step): gridless single-VMEM-block path.
    state_small = jax.random.normal(k_x, (8, state_size), jnp.float32)
    out_small = jax.block_until_ready(fwd(state_small, *params))
    ref_small = _ref_forward(state_small, w1, b1, w2, b2)
    assert out_small.shape == (8, action_size)
    assert jnp.allclose(out_small, ref_small, atol=1e-4, rtol=1e-4)

    # 2) Larger, non-multiple batch: 2-step "parallel" grid (v7x dual-TC row
    #    split) with a partial final block; no padding or slicing anywhere.
    state_big = jax.random.normal(k_xb, (500, state_size), jnp.float32)
    out_big = jax.block_until_ready(fwd(state_big, *params))
    ref_big = _ref_forward(state_big, w1, b1, w2, b2)
    assert out_big.shape == (500, action_size)
    assert jnp.allclose(out_big, ref_big, atol=1e-4, rtol=1e-4)

    print("KERNEL_OK")
</pallas_src>

<mosaic_0001>
module attributes {stable_mosaic.version = 11 : i64} {
  func.func @_mlp_kernel(%arg0: memref<8x32xf32, #tpu.memory_space<vmem>>, %arg1: memref<32x64xf32, #tpu.memory_space<vmem>>, %arg2: memref<1x64xf32, #tpu.memory_space<vmem>>, %arg3: memref<64x8xf32, #tpu.memory_space<vmem>>, %arg4: memref<1x8xf32, #tpu.memory_space<vmem>>, %arg5: memref<8x8xf32, #tpu.memory_space<vmem>>) attributes {dimension_semantics = [], scalar_prefetch = 0 : i64, scratch_operands = 0 : i64, tpu.core_type = #tpu.core_type<tc>} {
    %c0 = arith.constant 0 : index
    %c0_0 = arith.constant 0 : index
    %0 = vector.load %arg0[%c0, %c0_0] : memref<8x32xf32, #tpu.memory_space<vmem>>, vector<8x32xf32>
    %c0_1 = arith.constant 0 : index
    %c0_2 = arith.constant 0 : index
    %1 = vector.load %arg1[%c0_1, %c0_2] : memref<32x64xf32, #tpu.memory_space<vmem>>, vector<32x64xf32>
    %cst = arith.constant dense<0.000000e+00> : vector<8x64xf32>
    %2 = tpu.matmul %0, %1, %cst {dimension_numbers = #tpu.dot_dimension_numbers<[1], [0], [0], [1], [0, 0, 1, 1], [], []>} : vector<8x32xf32>, vector<32x64xf32>, vector<8x64xf32> -> vector<8x64xf32>
    %c0_3 = arith.constant 0 : index
    %c0_4 = arith.constant 0 : index
    %3 = vector.load %arg2[%c0_3, %c0_4] : memref<1x64xf32, #tpu.memory_space<vmem>>, vector<1x64xf32>
    %4 = vector.broadcast %3 : vector<1x64xf32> to vector<8x64xf32>
    %5 = arith.addf %2, %4 : vector<8x64xf32>
    %cst_5 = arith.constant 0.000000e+00 : f32
    %6 = vector.broadcast %cst_5 : f32 to vector<8x64xf32>
    %7 = arith.maximumf %5, %6 : vector<8x64xf32>
    %c0_6 = arith.constant 0 : index
    %c0_7 = arith.constant 0 : index
    %8 = vector.load %arg3[%c0_6, %c0_7] : memref<64x8xf32, #tpu.memory_space<vmem>>, vector<64x8xf32>
    %cst_8 = arith.constant dense<0.000000e+00> : vector<8x8xf32>
    %9 = tpu.matmul %7, %8, %cst_8 {dimension_numbers = #tpu.dot_dimension_numbers<[1], [0], [0], [1], [0, 0, 1, 1], [], []>} : vector<8x64xf32>, vector<64x8xf32>, vector<8x8xf32> -> vector<8x8xf32>
    %c0_9 = arith.constant 0 : index
    %c0_10 = arith.constant 0 : index
    %10 = vector.load %arg4[%c0_9, %c0_10] : memref<1x8xf32, #tpu.memory_space<vmem>>, vector<1x8xf32>
    %11 = vector.broadcast %10 : vector<1x8xf32> to vector<8x8xf32>
    %12 = arith.addf %9, %11 : vector<8x8xf32>
    %c0_11 = arith.constant 0 : index
    %c0_12 = arith.constant 0 : index
    %13 = vector.load %arg5[%c0_11, %c0_12] : memref<8x8xf32, #tpu.memory_space<vmem>>, vector<8x8xf32>
    tpu.vector_store %arg5[%c0_11, %c0_12], %12 {strides = array<i32>} : memref<8x8xf32, #tpu.memory_space<vmem>>, vector<8x8xf32>,
    return
  }
}

</mosaic_0001>

<bundles_post_ra>
// kernel: updated_model_forward.1
= control target key start
LH: loop header
LB: loop body
LE: loop exit
PB: predicated region body
PF: predicated region fallthrough
CT: control target
= control target key end

     0   :  { %s219_s0 = inlined_call_operand.vmem [shape: f32[8,32], index: 0, kind: input, shape index: {}]   ;;  %s220_s1 = inlined_call_operand.vmem [shape: f32[32,64], index: 1, kind: input, shape index: {}]   ;;  %s221_s2 = inlined_call_operand.vmem [shape: f32[1,64], index: 2, kind: input, shape index: {}]   ;;  %s222_s3 = inlined_call_operand.vmem [shape: f32[64,8], index: 3, kind: input, shape index: {}]   ;;  %s223_s4 = inlined_call_operand.vmem [shape: f32[1,8], index: 4, kind: input, shape index: {}]   ;;  %s224_s5 = inlined_call_operand.hbm [shape: f32[8,8], index: 5, kind: output, shape index: {}]  }
   0x1   :  { %v25_v0 = vld [vmem:[%s220_s1 + $0x18] sm:$0xff]  ;;  %v24_v1 = vld [vmem:[%s220_s1 + $0x10] sm:$0xff]  ;;  %v23_v3 = vld [vmem:[%s220_s1 + $0x8] sm:$0xff] }
   0x2   :  { %46 = vmatpush.msra.mxu0 %v25_v0  ;;  %v62_v2 = vld [vmem:[%s222_s3 + $0x38] sm:$0xff]  ;;  %v61_v4 = vld [vmem:[%s222_s3 + $0x30] sm:$0xff]  ;;  %v60_v5 = vld [vmem:[%s222_s3 + $0x28] sm:$0xff] }
   0x3   :  { %79 = vmatpush.msra.mxu1 %v62_v2  ;;  %v22_v6 = vld [vmem:[%s220_s1] sm:$0xff] }
   0x4   :  { %47 = vmatpush.msra.mxu0 %v24_v1 }
   0x5   :  { %80 = vmatpush.msra.mxu1 %v61_v4 }
   0x6   :  { %10 = vsyncpa [#allocation3], 0  ;;  %48 = vmatpush.msra.mxu0 %v23_v3  ;;  %v21_v7 = vld [vmem:[%s219_s0] sm:$0xff]  ;;  %vm30_vm0 = vcmask 261120   ;;  %v58_v9 = vld [vmem:[%s222_s3 + $0x18] sm:$0xff]  ;;  %vm67_vm1 = vcmask 523264  }
   0x7   :  { %v59_v8 = vld [vmem:[%s222_s3 + $0x20] sm:$0xff]  ;;  %81 = vmatpush.msra.mxu1 %v60_v5  ;;  %v57_v10 = vld [vmem:[%s222_s3 + $0x10] sm:$0xff]  ;;  %v56_v11 = vld [vmem:[%s222_s3 + $0x8] sm:$0xff]  ;;  %s140_s21 = smov [#allocation2]   ;;  %vm91_vm2 = vcmask 64512  }
   0x8   :  { %49 = vmatpush.msra.mxu0 %v22_v6  ;;  %v55_v12 = vld [vmem:[%s222_s3] sm:$0xff]  ;;  %s98_s22 = sshll.u32 %s140_s21, 4  ;;  %s100_s3 = sshll.u32 %s224_s5, 4  ;;  %s99_s22 = int_to_ptr.vmem [resolvable:$true] %s98_s22  ;;  %s101_s3 = int_to_ptr.hbm [resolvable:$true] %s100_s3 }
   0x9   :  { %109 = vmatmul.msk.f32.vlgmr.msra.gmra.mxu0 %vm30_vm0, %v21_v7  ;;  %82 = vmatpush.msra.mxu1 %v59_v8  ;;  %v112_v13 = vld [vmem:[%s221_s2] ss:$0 sm:$0xff] }
   0xa   :  { %v113_v17 = vld [vmem:[%s223_s4] ss:$0 sm:$0xff] }
   0xb   :  { %83 = vmatpush.msra.mxu1 %v58_v9 }
   0xd   :  { %84 = vmatpush.msra.mxu1 %v57_v10 }
   0xf   :  { %85 = vmatpush.msra.mxu1 %v56_v11 }
  0x11   :  { %86 = vmatpush.msra.mxu1 %v55_v12 }
  0x86   :  { %v51_v14 = vpop.f32.mrf.mxu0 }
  0x87   :  { %v52_v15 = vadd.f32 %v112_v13, %v51_v14 }
  0x89   :  { %v54_v16 = vmax.f32 %v52_v15, 0.0 }
  0x8b   :  { %110 = vmatmul.msk.f32.vlgmr.msra.gmra.mxu1 %vm67_vm1, %v54_v16 }
 0x108   :  { %v88_v18 = vpop.f32.mrf.mxu1 }
 0x109   :  { %v89_v19 = vadd.f32 %v113_v17, %v88_v18 }
 0x10b   :  { %92 = vst.msk [vmem:[#allocation2] sm:$0xff] %vm91_vm2, %v89_v19 }
 0x10c   :  { %103 = dma.vmem_to_hbm [thread:$0]  %s99_s22, 128, %s101_s3, [#allocation3]  }
 0x10d   :  { %138 = dma.done.wait [#allocation3], 128  }
 0x10e   :  { %139 = vsyncadd [#allocation3], 4294967168 }
 0x10f   :  { %108 = vsyncpa [#allocation3], 1 }

</bundles_post_ra>
